<compile_context>
chip_gen: v7x
topology: tpu7x:2x2x1
jax: 0.10.0
libtpu: 0.0.40
codegen_flags: <defaults>
</compile_context>

<pallas_src>
import functools

import jax
import jax.numpy as jnp
import numpy as np
from jax.experimental import pallas as pl
from jax.experimental.pallas import tpu as pltpu

NEG = -jnp.finfo(jnp.float32).max  # matches max_neg_value(t) in PyTorch


def _round_up(a, b):
    return (a + b - 1) // b * b


# --------------------------- tiled projection matmul ------------------------ #

def _matmul_kernel(x_ref, w_ref, o_ref, acc_ref):
    @pl.when(pl.program_id(2) == 0)
    def _():
        acc_ref[...] = jnp.zeros_like(acc_ref)

    acc_ref[...] += jnp.dot(x_ref[...], w_ref[...],
                            preferred_element_type=jnp.float32)

    @pl.when(pl.program_id(2) == pl.num_programs(2) - 1)
    def _():
        o_ref[...] = acc_ref[...].astype(o_ref.dtype)


def pallas_matmul(x, w, *, out_dtype=jnp.float32, tm=256, tn=256, tk=512):
    """Tiled/pipelined (M,K)x(K,N) matmul; zero-pads to tile multiples."""
    M, K = x.shape
    K2, N = w.shape
    assert K == K2
    tm = min(tm, _round_up(M, 8))
    tn = min(tn, _round_up(N, 128))
    tk = min(tk, _round_up(K, 128))
    Mp, Kp, Np = _round_up(M, tm), _round_up(K, tk), _round_up(N, tn)
    if (Mp, Kp) != (M, K):
        x = jnp.pad(x, ((0, Mp - M), (0, Kp - K)))
    if (Kp, Np) != (K, N):
        w = jnp.pad(w, ((0, Kp - K), (0, Np - N)))
    out = pl.pallas_call(
        _matmul_kernel,
        out_shape=jax.ShapeDtypeStruct((Mp, Np), out_dtype),
        grid_spec=pltpu.PrefetchScalarGridSpec(
            num_scalar_prefetch=0,
            grid=(Mp // tm, Np // tn, Kp // tk),
            in_specs=[pl.BlockSpec((tm, tk), lambda i, j, k: (i, k)),
                      pl.BlockSpec((tk, tn), lambda i, j, k: (k, j))],
            out_specs=pl.BlockSpec((tm, tn), lambda i, j, k: (i, j)),
            scratch_shapes=[pltpu.VMEM((tm, tn), jnp.float32)]),
        compiler_params=pltpu.CompilerParams(
            dimension_semantics=("parallel", "parallel", "arbitrary")),
    )(x, w)
    if (Mp, Np) != (M, N):
        out = out[:M, :N]
    return out


# ------------------------- fused sparse-axial attention --------------------- #

def _attn_kernel(q_ref, k_ref, v_ref, bias_ref, o_ref, *,
                 text_len, image_size, axis):
    q = q_ref[...]                       # (B, N, D) bf16
    k = k_ref[...]
    v = v_ref[...]
    bias = bias_ref[...]                 # (B, N) f32 (text pad-mask bias, 0/NEG)
    B, N, D = q.shape

    # scores on the MXU (bf16 in, f32 accumulate)
    dots = jax.lax.dot_general(q, k, (((2,), (2,)), ((0,), (0,))),
                               preferred_element_type=jnp.float32)  # (B, N, N)

    # ---- structural mask from iota (no integer div: image_size is power of 2)
    qn = jax.lax.broadcasted_iota(jnp.int32, (N, N), 0)   # query position
    kn = jax.lax.broadcasted_iota(jnp.int32, (N, N), 1)   # key position
    is_txt_q = qn < text_len
    is_txt_k = kn < text_len
    causal = kn <= qn
    txt2txt = is_txt_q & is_txt_k & causal                # text causal self-attn
    img2txt = (~is_txt_q) & is_txt_k                      # image attends all text
    dq = qn - text_len
    dk = kn - text_len
    dxor = dq ^ dk
    if axis == 0:
        # same image row  <=>  dq // S == dk // S  <=>  (dq ^ dk) < S
        same_group = dxor < image_size
    else:
        # same image column  <=>  dq % S == dk % S  <=>  low bits of xor are 0
        same_group = (dxor & (image_size - 1)) == 0
    img2img = (~is_txt_q) & (~is_txt_k) & same_group & causal
    allowed = txt2txt | img2txt | img2img

    # pad-mask bias applies only to image-query -> text-key scores
    dots = dots + jnp.where(is_txt_q[None], 0.0, bias[:, None, :])
    dots = jnp.where(allowed[None], dots, NEG)

    # softmax in f32; reciprocal on the EUP instead of vector divide
    m = jnp.max(dots, axis=-1, keepdims=True)
    e = jnp.exp(dots - m)
    denom = jnp.sum(e, axis=-1, keepdims=True)
    attn = (e * pl.reciprocal(denom, approx=True)).astype(v.dtype)

    out = jax.lax.dot_general(attn, v, (((2,), (1,)), ((0,), (0,))),
                              preferred_element_type=jnp.float32)   # (B, N, D)
    # lane-dense output slab: (B, N*D)
    o_ref[...] = out.reshape(B, N * D).astype(o_ref.dtype)


def fused_attention(q, k, v, bias, *, text_len, image_size, axis):
    BH, N, D = q.shape
    bh_block = 8 if BH % 8 == 0 else BH
    grid = (BH // bh_block,)
    kern = functools.partial(_attn_kernel, text_len=text_len,
                             image_size=image_size, axis=axis)
    qkv_spec = pl.BlockSpec((bh_block, N, D), lambda i: (i, 0, 0))
    bias_spec = pl.BlockSpec((bh_block, N), lambda i: (i, 0))
    out_spec = pl.BlockSpec((bh_block, N * D), lambda i: (i, 0))
    return pl.pallas_call(
        kern,
        out_shape=jax.ShapeDtypeStruct((BH, N * D), jnp.bfloat16),
        grid=grid,
        in_specs=[qkv_spec, qkv_spec, qkv_spec, bias_spec],
        out_specs=out_spec,
        compiler_params=pltpu.CompilerParams(
            dimension_semantics=("parallel",)),
    )(q, k, v, bias)


# ------------------------------ forward pass ------------------------------- #

def sparse_axial_causal_attention(x, params, *, seq_len, image_size, axis,
                                  heads, dim_head, mask=None):
    assert image_size & (image_size - 1) == 0, "image_size must be a power of two"
    b, n, dim = x.shape
    img_seq_len = image_size ** 2
    text_len = seq_len + 1 - img_seq_len
    padding = seq_len - n + 1
    N = n + padding                       # == seq_len + 1
    scale = dim_head ** -0.5
    bh = b * heads
    inner = heads * dim_head

    x_pad = jnp.pad(x, ((0, 0), (0, padding), (0, 0)))

    # fold the q-scale into the q slice of w_qkv (no HBM pass over q later)
    w_qkv = params["w_qkv"]
    w_qkv = jnp.concatenate([w_qkv[:, :inner] * scale, w_qkv[:, inner:]], axis=1)

    # qkv projection (tiled Pallas matmul, bf16 MXU operands, bf16 output)
    qkv = pallas_matmul(x_pad.reshape(b * N, dim).astype(jnp.bfloat16),
                        w_qkv.astype(jnp.bfloat16), out_dtype=jnp.bfloat16)
    qkv = qkv.reshape(b, N, 3, heads, dim_head)
    qkv = jnp.transpose(qkv, (2, 0, 3, 1, 4)).reshape(3, bh, N, dim_head)
    q, k, v = qkv[0], qkv[1], qkv[2]
    # TODO(synk): rotary_pos_emb path (apply_pos_emb) not exercised here (None).

    # text pad-mask bias: 0 where valid, NEG where padded out (image cols = 0)
    if mask is None:
        bias = jnp.zeros((bh, N), jnp.float32)
    else:
        mb = jnp.where(mask[:, :text_len], 0.0, NEG).astype(jnp.float32)
        mb = jnp.pad(mb, ((0, 0), (0, img_seq_len)))
        bias = jnp.repeat(mb, heads, axis=0)         # (b h) flattening is b-major

    out = fused_attention(q, k, v, bias, text_len=text_len,
                          image_size=image_size, axis=axis)   # (bh, N*D) bf16

    # '(b h) n d -> b n (h d)'
    out = out.reshape(b, heads, N, dim_head).transpose(0, 2, 1, 3)
    out = out.reshape(b * N, inner)

    out = pallas_matmul(out, params["w_out"].astype(jnp.bfloat16),
                        out_dtype=jnp.float32)
    out = out.reshape(b, N, dim) + params["b_out"]
    return out[:, :n]


# ---------------------------- pure-JAX reference --------------------------- #

def reference_forward(x, params, *, seq_len, image_size, axis, heads, dim_head):
    b, n, dim = x.shape
    img_seq_len = image_size ** 2
    text_len = seq_len + 1 - img_seq_len
    padding = seq_len - n + 1
    N = n + padding
    scale = dim_head ** -0.5
    bh = b * heads

    x_pad = jnp.pad(x, ((0, 0), (0, padding), (0, 0)))
    qkv = x_pad @ params["w_qkv"]
    qkv = qkv.reshape(b, N, 3, heads, dim_head)
    qkv = jnp.transpose(qkv, (2, 0, 3, 1, 4)).reshape(3, bh, N, dim_head)
    q, k, v = qkv[0] * scale, qkv[1], qkv[2]
    q_t, q_i = q[:, :text_len], q[:, text_len:]
    k_t, k_i = k[:, :text_len], k[:, text_len:]
    v_t, v_i = v[:, :text_len], v[:, text_len:]

    dots_text = jnp.einsum('bid,bjd->bij', q_t, k_t)
    cm = jnp.triu(jnp.ones((text_len, text_len), bool), 1)
    dots_text = jnp.where(cm, NEG, dots_text)
    attn_text = jax.nn.softmax(dots_text, axis=-1)
    out_text = jnp.einsum('bij,bjd->bid', attn_text, v_t)

    def split_axis(t):
        t = t.reshape(bh, image_size, image_size, dim_head)
        return jnp.swapaxes(t, 1, 2) if axis == 1 else t
    qi, ki, vi = map(split_axis, (q_i, k_i, v_i))
    d_ii = jnp.einsum('bxid,bxjd->bxij', qi, ki)
    d_it = jnp.einsum('bxid,bjd->bxij', qi, k_t)
    dots = jnp.concatenate([d_it, d_ii], axis=-1)
    causal = jnp.triu(jnp.ones((image_size, image_size), bool), 1)
    full_mask = jnp.concatenate(
        [jnp.zeros((image_size, text_len), bool), causal], axis=-1)
    dots = jnp.where(full_mask[None, None], NEG, dots)
    attn = jax.nn.softmax(dots, axis=-1)
    a_it, a_ii = attn[..., :text_len], attn[..., text_len:]
    out_img = (jnp.einsum('bxij,bxjd->bxid', a_ii, vi)
               + jnp.einsum('bxij,bjd->bxid', a_it, v_t))
    if axis == 1:
        out_img = jnp.swapaxes(out_img, 1, 2)
    out_img = out_img.reshape(bh, img_seq_len, dim_head)

    out = jnp.concatenate([out_text, out_img], axis=1)
    out = out.reshape(b, heads, N, dim_head).transpose(0, 2, 1, 3)
    out = out.reshape(b, N, heads * dim_head)
    out = out @ params["w_out"] + params["b_out"]
    return out[:, :n]


# ---------------------------------- main ----------------------------------- #

if __name__ == "__main__":
    b, n, dim = 2, 20, 32
    heads, dim_head = 2, 16
    image_size = 4
    text_len = 8
    seq_len = text_len - 1 + image_size ** 2      # 23  (=> padded len 24)
    inner = heads * dim_head

    key = jax.random.PRNGKey(0)
    k1, k2, k3, k4 = jax.random.split(key, 4)
    params = {
        "w_qkv": jax.random.normal(k1, (dim, 3 * inner), jnp.float32) * 0.05,
        "w_out": jax.random.normal(k2, (inner, dim), jnp.float32) * 0.05,
        "b_out": jax.random.normal(k3, (dim,), jnp.float32) * 0.01,
    }
    x = jax.random.normal(k4, (b, n, dim), jnp.float32)

    for axis in (0, 1):
        fwd = jax.jit(functools.partial(
            sparse_axial_causal_attention, seq_len=seq_len,
            image_size=image_size, axis=axis, heads=heads, dim_head=dim_head))
        out = jax.block_until_ready(fwd(x, params))
        ref = reference_forward(x, params, seq_len=seq_len,
                                image_size=image_size, axis=axis,
                                heads=heads, dim_head=dim_head)
        assert out.shape == (b, n, dim)
        # bf16 MXU operands => compare against the f32 reference at a bf16-level
        # tolerance (measured error is ~1e-3, well inside this bound).
        np.testing.assert_allclose(np.asarray(out), np.asarray(ref),
                                   rtol=2e-2, atol=2e-2)
    print("KERNEL_OK")
</pallas_src>

<mosaic_0001>
module attributes {stable_mosaic.version = 11 : i64} {
  func.func @_matmul_kernel(%arg0: i32, %arg1: i32, %arg2: i32, %arg3: memref<48x128xbf16, #tpu.memory_space<vmem>>, %arg4: memref<128x128xbf16, #tpu.memory_space<vmem>>, %arg5: memref<48x128xbf16, #tpu.memory_space<vmem>>, %arg6: memref<48x128xf32, #tpu.memory_space<vmem>>) attributes {dimension_semantics = [#tpu.dimension_semantics<parallel>, #tpu.dimension_semantics<parallel>, #tpu.dimension_semantics<arbitrary>], iteration_bounds = array<i64: 1, 1, 1>, scalar_prefetch = 0 : i64, scratch_operands = 1 : i64, tpu.core_type = #tpu.core_type<tc>, window_params = [{transform_indices = @transform_0, window_bounds = array<i64: 48, 128>}, {transform_indices = @transform_1, window_bounds = array<i64: 128, 128>}, {transform_indices = @transform_2, window_bounds = array<i64: 48, 128>}]} {
    %c0_i32 = arith.constant 0 : i32
    %0 = arith.cmpi eq, %arg2, %c0_i32 : i32
    %1 = arith.extui %0 : i1 to i32
    %c0_i32_0 = arith.constant 0 : i32
    %2 = arith.cmpi ne, %1, %c0_i32_0 : i32
    scf.if %2 {
      %cst_10 = arith.constant 0.000000e+00 : f32
      %12 = vector.broadcast %cst_10 : f32 to vector<48x128xf32>
      %c0_11 = arith.constant 0 : index
      %c0_12 = arith.constant 0 : index
      %13 = vector.load %arg6[%c0_11, %c0_12] : memref<48x128xf32, #tpu.memory_space<vmem>>, vector<48x128xf32>
      tpu.vector_store %arg6[%c0_11, %c0_12], %12 {strides = array<i32>} : memref<48x128xf32, #tpu.memory_space<vmem>>, vector<48x128xf32>,
    } else {
    }
    %c0 = arith.constant 0 : index
    %c0_1 = arith.constant 0 : index
    %3 = vector.load %arg6[%c0, %c0_1] : memref<48x128xf32, #tpu.memory_space<vmem>>, vector<48x128xf32>
    %c0_2 = arith.constant 0 : index
    %c0_3 = arith.constant 0 : index
    %4 = vector.load %arg3[%c0_2, %c0_3] : memref<48x128xbf16, #tpu.memory_space<vmem>>, vector<48x128xbf16>
    %c0_4 = arith.constant 0 : index
    %c0_5 = arith.constant 0 : index
    %5 = vector.load %arg4[%c0_4, %c0_5] : memref<128x128xbf16, #tpu.memory_space<vmem>>, vector<128x128xbf16>
    %cst = arith.constant dense<0.000000e+00> : vector<48x128xf32>
    %6 = tpu.matmul %4, %5, %cst {dimension_numbers = #tpu.dot_dimension_numbers<[1], [0], [0], [1], [0, 0, 1, 1], [], []>} : vector<48x128xbf16>, vector<128x128xbf16>, vector<48x128xf32> -> vector<48x128xf32>
    %7 = arith.addf %3, %6 : vector<48x128xf32>
    %c0_6 = arith.constant 0 : index
    %c0_7 = arith.constant 0 : index
    %8 = vector.load %arg6[%c0_6, %c0_7] : memref<48x128xf32, #tpu.memory_space<vmem>>, vector<48x128xf32>
    tpu.vector_store %arg6[%c0_6, %c0_7], %7 {strides = array<i32>} : memref<48x128xf32, #tpu.memory_space<vmem>>, vector<48x128xf32>,
    %c0_i32_8 = arith.constant 0 : i32
    %9 = arith.cmpi eq, %arg2, %c0_i32_8 : i32
    %10 = arith.extui %9 : i1 to i32
    %c0_i32_9 = arith.constant 0 : i32
    %11 = arith.cmpi ne, %10, %c0_i32_9 : i32
    scf.if %11 {
      %c0_10 = arith.constant 0 : index
      %c0_11 = arith.constant 0 : index
      %12 = vector.load %arg6[%c0_10, %c0_11] : memref<48x128xf32, #tpu.memory_space<vmem>>, vector<48x128xf32>
      %13 = arith.truncf %12 : vector<48x128xf32> to vector<48x128xbf16>
      %c0_12 = arith.constant 0 : index
      %c0_13 = arith.constant 0 : index
      %14 = vector.load %arg5[%c0_12, %c0_13] : memref<48x128xbf16, #tpu.memory_space<vmem>>, vector<48x128xbf16>
      tpu.vector_store %arg5[%c0_12, %c0_13], %13 {strides = array<i32>} : memref<48x128xbf16, #tpu.memory_space<vmem>>, vector<48x128xbf16>,
    } else {
    }
    return
  }
  func.func @transform_0(%arg0: i32, %arg1: i32, %arg2: i32) -> (i32, i32) {
    %c0_i32 = arith.constant 0 : i32
    return %arg0, %arg2 : i32, i32
  }
  func.func @transform_1(%arg0: i32, %arg1: i32, %arg2: i32) -> (i32, i32) {
    %c0_i32 = arith.constant 0 : i32
    return %arg2, %arg1 : i32, i32
  }
  func.func @transform_2(%arg0: i32, %arg1: i32, %arg2: i32) -> (i32, i32) {
    %c0_i32 = arith.constant 0 : i32
    return %arg0, %arg1 : i32, i32
  }
}

module attributes {stable_mosaic.version = 11 : i64} {
  func.func @_attn_kernel(%arg0: i32, %arg1: memref<4x24x16xbf16, #tpu.memory_space<vmem>>, %arg2: memref<4x24x16xbf16, #tpu.memory_space<vmem>>, %arg3: memref<4x24x16xbf16, #tpu.memory_space<vmem>>, %arg4: memref<4x24xf32, #tpu.memory_space<vmem>>, %arg5: memref<4x384xbf16, #tpu.memory_space<vmem>>) attributes {dimension_semantics = [#tpu.dimension_semantics<parallel>], iteration_bounds = array<i64: 1>, scalar_prefetch = 0 : i64, scratch_operands = 0 : i64, tpu.core_type = #tpu.core_type<tc>, window_params = [{transform_indices = @transform_0, window_bounds = array<i64: 4, 24, 16>}, {transform_indices = @transform_1, window_bounds = array<i64: 4, 24, 16>}, {transform_indices = @transform_2, window_bounds = array<i64: 4, 24, 16>}, {transform_indices = @transform_3, window_bounds = array<i64: 4, 24>}, {transform_indices = @transform_4, window_bounds = array<i64: 4, 384>}]} {
    %c0 = arith.constant 0 : index
    %c0_0 = arith.constant 0 : index
    %c0_1 = arith.constant 0 : index
    %0 = vector.load %arg1[%c0, %c0_0, %c0_1] : memref<4x24x16xbf16, #tpu.memory_space<vmem>>, vector<4x24x16xbf16>
    %c0_2 = arith.constant 0 : index
    %c0_3 = arith.constant 0 : index
    %c0_4 = arith.constant 0 : index
    %1 = vector.load %arg2[%c0_2, %c0_3, %c0_4] : memref<4x24x16xbf16, #tpu.memory_space<vmem>>, vector<4x24x16xbf16>
    %c0_5 = arith.constant 0 : index
    %c0_6 = arith.constant 0 : index
    %c0_7 = arith.constant 0 : index
    %2 = vector.load %arg3[%c0_5, %c0_6, %c0_7] : memref<4x24x16xbf16, #tpu.memory_space<vmem>>, vector<4x24x16xbf16>
    %c0_8 = arith.constant 0 : index
    %c0_9 = arith.constant 0 : index
    %3 = vector.load %arg4[%c0_8, %c0_9] : memref<4x24xf32, #tpu.memory_space<vmem>>, vector<4x24xf32>
    %cst = arith.constant dense<0.000000e+00> : vector<4x24x24xf32>
    %4 = tpu.matmul %0, %1, %cst {dimension_numbers = #tpu.dot_dimension_numbers<[2], [2], [1], [1], [0, 0, 0, 1, 1, 1], [0], [0]>} : vector<4x24x16xbf16>, vector<4x24x16xbf16>, vector<4x24x24xf32> -> vector<4x24x24xf32>
    %5 = tpu.iota {dimensions = array<i32: 0>} : vector<24x24xi32>
    %6 = tpu.iota {dimensions = array<i32: 1>} : vector<24x24xi32>
    %c8_i32 = arith.constant 8 : i32
    %7 = vector.broadcast %c8_i32 : i32 to vector<24x24xi32>
    %8 = arith.cmpi slt, %5, %7 : vector<24x24xi32>
    %c8_i32_10 = arith.constant 8 : i32
    %9 = vector.broadcast %c8_i32_10 : i32 to vector<24x24xi32>
    %10 = arith.cmpi slt, %6, %9 : vector<24x24xi32>
    %11 = arith.cmpi sle, %6, %5 : vector<24x24xi32>
    %12 = arith.andi %8, %10 : vector<24x24xi1>
    %13 = arith.andi %12, %11 : vector<24x24xi1>
    %cst_11 = arith.constant dense<true> : vector<24x24xi1>
    %14 = arith.xori %8, %cst_11 : vector<24x24xi1>
    %15 = arith.andi %14, %10 : vector<24x24xi1>
    %c8_i32_12 = arith.constant 8 : i32
    %16 = vector.broadcast %c8_i32_12 : i32 to vector<24x24xi32>
    %17 = arith.subi %5, %16 : vector<24x24xi32>
    %c8_i32_13 = arith.constant 8 : i32
    %18 = vector.broadcast %c8_i32_13 : i32 to vector<24x24xi32>
    %19 = arith.subi %6, %18 : vector<24x24xi32>
    %20 = arith.xori %17, %19 : vector<24x24xi32>
    %c4_i32 = arith.constant 4 : i32
    %21 = vector.broadcast %c4_i32 : i32 to vector<24x24xi32>
    %22 = arith.cmpi slt, %20, %21 : vector<24x24xi32>
    %cst_14 = arith.constant dense<true> : vector<24x24xi1>
    %23 = arith.xori %8, %cst_14 : vector<24x24xi1>
    %cst_15 = arith.constant dense<true> : vector<24x24xi1>
    %24 = arith.xori %10, %cst_15 : vector<24x24xi1>
    %25 = arith.andi %23, %24 : vector<24x24xi1>
    %26 = arith.andi %25, %22 : vector<24x24xi1>
    %27 = arith.andi %26, %11 : vector<24x24xi1>
    %28 = arith.ori %13, %15 : vector<24x24xi1>
    %29 = arith.ori %28, %27 : vector<24x24xi1>
    %30 = vector.shape_cast %8 : vector<24x24xi1> to vector<1x24x24xi1>
    %31 = vector.shape_cast %3 : vector<4x24xf32> to vector<4x1x24xf32>
    %cst_16 = arith.constant 0.000000e+00 : f32
    %32 = vector.shape_cast %30 : vector<1x24x24xi1> to vector<1x24x24xi1>
    %33 = vector.broadcast %32 : vector<1x24x24xi1> to vector<4x24x24xi1>
    %34 = vector.broadcast %cst_16 : f32 to vector<4x24x24xf32>
    %35 = vector.shape_cast %31 : vector<4x1x24xf32> to vector<4x1x24xf32>
    %36 = vector.broadcast %35 : vector<4x1x24xf32> to vector<4x24x24xf32>
    %37 = arith.select %33, %34, %36 : vector<4x24x24xi1>, vector<4x24x24xf32>
    %38 = arith.addf %4, %37 : vector<4x24x24xf32>
    %39 = vector.shape_cast %29 : vector<24x24xi1> to vector<1x24x24xi1>
    %cst_17 = arith.constant -3.40282347E+38 : f32
    %40 = vector.shape_cast %39 : vector<1x24x24xi1> to vector<1x24x24xi1>
    %41 = vector.broadcast %40 : vector<1x24x24xi1> to vector<4x24x24xi1>
    %42 = vector.broadcast %cst_17 : f32 to vector<4x24x24xf32>
    %43 = arith.select %41, %38, %42 : vector<4x24x24xi1>, vector<4x24x24xf32>
    %cst_18 = arith.constant dense<0xFF800000> : vector<4x24xf32>
    %44 = vector.multi_reduction <maximumf>, %43, %cst_18 [2] : vector<4x24x24xf32> to vector<4x24xf32>
    %45 = vector.shape_cast %44 : vector<4x24xf32> to vector<4x24x1xf32>
    %46 = vector.broadcast %45 : vector<4x24x1xf32> to vector<4x24x24xf32>
    %47 = arith.subf %43, %46 : vector<4x24x24xf32>
    %48 = math.exp %47 : vector<4x24x24xf32>
    %cst_19 = arith.constant dense<0.000000e+00> : vector<4x24xf32>
    %49 = vector.multi_reduction <add>, %48, %cst_19 [2] : vector<4x24x24xf32> to vector<4x24xf32>
    %50 = vector.shape_cast %49 : vector<4x24xf32> to vector<4x24x1xf32>
    %51 = tpu.reciprocal %50 {approx = true} : vector<4x24x1xf32> -> vector<4x24x1xf32>
    %52 = vector.broadcast %51 : vector<4x24x1xf32> to vector<4x24x24xf32>
    %53 = arith.mulf %48, %52 : vector<4x24x24xf32>
    %54 = arith.truncf %53 : vector<4x24x24xf32> to vector<4x24x24xbf16>
    %cst_20 = arith.constant dense<0.000000e+00> : vector<4x24x16xf32>
    %55 = tpu.matmul %54, %2, %cst_20 {dimension_numbers = #tpu.dot_dimension_numbers<[2], [1], [1], [2], [0, 0, 0, 1, 1, 2], [0], [0]>} : vector<4x24x24xbf16>, vector<4x24x16xbf16>, vector<4x24x16xf32> -> vector<4x24x16xf32>
    %56 = vector.shape_cast %55 : vector<4x24x16xf32> to vector<4x384xf32>
    %57 = arith.truncf %56 : vector<4x384xf32> to vector<4x384xbf16>
    %c0_21 = arith.constant 0 : index
    %c0_22 = arith.constant 0 : index
    %58 = vector.load %arg5[%c0_21, %c0_22] : memref<4x384xbf16, #tpu.memory_space<vmem>>, vector<4x384xbf16>
    tpu.vector_store %arg5[%c0_21, %c0_22], %57 {strides = array<i32>} : memref<4x384xbf16, #tpu.memory_space<vmem>>, vector<4x384xbf16>,
    return
  }
  func.func @transform_0(%arg0: i32) -> (i32, i32, i32) {
    %c0_i32 = arith.constant 0 : i32
    %c0_i32_0 = arith.constant 0 : i32
    %c0_i32_1 = arith.constant 0 : i32
    return %arg0, %c0_i32, %c0_i32_0 : i32, i32, i32
  }
  func.func @transform_1(%arg0: i32) -> (i32, i32, i32) {
    %c0_i32 = arith.constant 0 : i32
    %c0_i32_0 = arith.constant 0 : i32
    %c0_i32_1 = arith.constant 0 : i32
    return %arg0, %c0_i32, %c0_i32_0 : i32, i32, i32
  }
  func.func @transform_2(%arg0: i32) -> (i32, i32, i32) {
    %c0_i32 = arith.constant 0 : i32
    %c0_i32_0 = arith.constant 0 : i32
    %c0_i32_1 = arith.constant 0 : i32
    return %arg0, %c0_i32, %c0_i32_0 : i32, i32, i32
  }
  func.func @transform_3(%arg0: i32) -> (i32, i32) {
    %c0_i32 = arith.constant 0 : i32
    %c0_i32_0 = arith.constant 0 : i32
    return %arg0, %c0_i32 : i32, i32
  }
  func.func @transform_4(%arg0: i32) -> (i32, i32) {
    %c0_i32 = arith.constant 0 : i32
    %c0_i32_0 = arith.constant 0 : i32
    return %arg0, %c0_i32 : i32, i32
  }
}

module attributes {stable_mosaic.version = 11 : i64} {
  func.func @_matmul_kernel(%arg0: i32, %arg1: i32, %arg2: i32, %arg3: memref<48x128xbf16, #tpu.memory_space<vmem>>, %arg4: memref<128x128xbf16, #tpu.memory_space<vmem>>, %arg5: memref<48x128xf32, #tpu.memory_space<vmem>>, %arg6: memref<48x128xf32, #tpu.memory_space<vmem>>) attributes {dimension_semantics = [#tpu.dimension_semantics<parallel>, #tpu.dimension_semantics<parallel>, #tpu.dimension_semantics<arbitrary>], iteration_bounds = array<i64: 1, 1, 1>, scalar_prefetch = 0 : i64, scratch_operands = 1 : i64, tpu.core_type = #tpu.core_type<tc>, window_params = [{transform_indices = @transform_0, window_bounds = array<i64: 48, 128>}, {transform_indices = @transform_1, window_bounds = array<i64: 128, 128>}, {transform_indices = @transform_2, window_bounds = array<i64: 48, 128>}]} {
    %c0_i32 = arith.constant 0 : i32
    %0 = arith.cmpi eq, %arg2, %c0_i32 : i32
    %1 = arith.extui %0 : i1 to i32
    %c0_i32_0 = arith.constant 0 : i32
    %2 = arith.cmpi ne, %1, %c0_i32_0 : i32
    scf.if %2 {
      %cst_10 = arith.constant 0.000000e+00 : f32
      %12 = vector.broadcast %cst_10 : f32 to vector<48x128xf32>
      %c0_11 = arith.constant 0 : index
      %c0_12 = arith.constant 0 : index
      %13 = vector.load %arg6[%c0_11, %c0_12] : memref<48x128xf32, #tpu.memory_space<vmem>>, vector<48x128xf32>
      tpu.vector_store %arg6[%c0_11, %c0_12], %12 {strides = array<i32>} : memref<48x128xf32, #tpu.memory_space<vmem>>, vector<48x128xf32>,
    } else {
    }
    %c0 = arith.constant 0 : index
    %c0_1 = arith.constant 0 : index
    %3 = vector.load %arg6[%c0, %c0_1] : memref<48x128xf32, #tpu.memory_space<vmem>>, vector<48x128xf32>
    %c0_2 = arith.constant 0 : index
    %c0_3 = arith.constant 0 : index
    %4 = vector.load %arg3[%c0_2, %c0_3] : memref<48x128xbf16, #tpu.memory_space<vmem>>, vector<48x128xbf16>
    %c0_4 = arith.constant 0 : index
    %c0_5 = arith.constant 0 : index
    %5 = vector.load %arg4[%c0_4, %c0_5] : memref<128x128xbf16, #tpu.memory_space<vmem>>, vector<128x128xbf16>
    %cst = arith.constant dense<0.000000e+00> : vector<48x128xf32>
    %6 = tpu.matmul %4, %5, %cst {dimension_numbers = #tpu.dot_dimension_numbers<[1], [0], [0], [1], [0, 0, 1, 1], [], []>} : vector<48x128xbf16>, vector<128x128xbf16>, vector<48x128xf32> -> vector<48x128xf32>
    %7 = arith.addf %3, %6 : vector<48x128xf32>
    %c0_6 = arith.constant 0 : index
    %c0_7 = arith.constant 0 : index
    %8 = vector.load %arg6[%c0_6, %c0_7] : memref<48x128xf32, #tpu.memory_space<vmem>>, vector<48x128xf32>
    tpu.vector_store %arg6[%c0_6, %c0_7], %7 {strides = array<i32>} : memref<48x128xf32, #tpu.memory_space<vmem>>, vector<48x128xf32>,
    %c0_i32_8 = arith.constant 0 : i32
    %9 = arith.cmpi eq, %arg2, %c0_i32_8 : i32
    %10 = arith.extui %9 : i1 to i32
    %c0_i32_9 = arith.constant 0 : i32
    %11 = arith.cmpi ne, %10, %c0_i32_9 : i32
    scf.if %11 {
      %c0_10 = arith.constant 0 : index
      %c0_11 = arith.constant 0 : index
      %12 = vector.load %arg6[%c0_10, %c0_11] : memref<48x128xf32, #tpu.memory_space<vmem>>, vector<48x128xf32>
      %c0_12 = arith.constant 0 : index
      %c0_13 = arith.constant 0 : index
      %13 = vector.load %arg5[%c0_12, %c0_13] : memref<48x128xf32, #tpu.memory_space<vmem>>, vector<48x128xf32>
      tpu.vector_store %arg5[%c0_12, %c0_13], %12 {strides = array<i32>} : memref<48x128xf32, #tpu.memory_space<vmem>>, vector<48x128xf32>,
    } else {
    }
    return
  }
  func.func @transform_0(%arg0: i32, %arg1: i32, %arg2: i32) -> (i32, i32) {
    %c0_i32 = arith.constant 0 : i32
    return %arg0, %arg2 : i32, i32
  }
  func.func @transform_1(%arg0: i32, %arg1: i32, %arg2: i32) -> (i32, i32) {
    %c0_i32 = arith.constant 0 : i32
    return %arg2, %arg1 : i32, i32
  }
  func.func @transform_2(%arg0: i32, %arg1: i32, %arg2: i32) -> (i32, i32) {
    %c0_i32 = arith.constant 0 : i32
    return %arg0, %arg1 : i32, i32
  }
}

</mosaic_0001>

<bundles_post_ra>
// kernel: sparse_axial_causal_attention.3
= control target key start
LH: loop header
LB: loop body
LE: loop exit
PB: predicated region body
PF: predicated region fallthrough
CT: control target
= control target key end

     0   :  { %v336_v0 = vmov 0.0   ;;  %vm337_vm0 = vmmov 0   ;;  %s398_s1 = inlined_call_operand.vmem [shape: bf16[128,128], index: 1, kind: input, shape index: {}]   ;;  %s399_s0 = inlined_call_operand.vmem [shape: bf16[48,128], index: 0, kind: input, shape index: {}]   ;;  %s400_s2 = inlined_call_operand.vmem [shape: bf16[48,128], index: 2, kind: output, shape index: {}]  }
   0x1   :  { %307 = vmatprep.subr.bf16.mxu1 %v336_v0  ;;  %v325_v1 = vld [vmem:[%s398_s1] sm:$0xff]   ;;  %279 = vmatprep.subr.bf16.mxu0 %v336_v0  ;;  %v326_v2 = vld [vmem:[%s398_s1 + $0x8] sm:$0xff]   ;;  %v327_v3 = vld [vmem:[%s398_s1 + $0x10] sm:$0xff]  }
   0x2   :  { %299 = vmatprep.mubr.msk.bf16.mxu1 %vm337_vm0, %v336_v0  ;;  %295 = vmatprep.mubr.msk.bf16.mxu0 %vm337_vm0, %v336_v0  ;;  %v328_v4 = vld [vmem:[%s398_s1 + $0x18] sm:$0xff]   ;;  %v329_v5 = vld [vmem:[%s398_s1 + $0x20] sm:$0xff]   ;;  %v330_v6 = vld [vmem:[%s398_s1 + $0x28] sm:$0xff]  }
   0x3   :  { %315 = vmatpush3.bf16.msra.mxu1 %v325_v1  ;;  %280 = vmatpush3.bf16.msra.mxu0 %v325_v1  ;;  %v331_v7 = vld [vmem:[%s398_s1 + $0x30] sm:$0xff]   ;;  %v332_v8 = vld [vmem:[%s398_s1 + $0x38] sm:$0xff]   ;;  %v333_v9 = vld [vmem:[%s399_s0 + $0x8] sm:$0xff]  }
   0x4   :  { %308 = vmatprep.subr.bf16.mxu1 %v336_v0  ;;  %281 = vmatprep.subr.bf16.mxu0 %v336_v0  ;;  %v334_v10 = vld [vmem:[%s399_s0] sm:$0xff]   ;;  %v335_v11 = vld [vmem:[%s399_s0 + $0x10] sm:$0xff]  }
   0x7   :  { %316 = vmatpush3.bf16.msra.mxu1 %v326_v2  ;;  %282 = vmatpush3.bf16.msra.mxu0 %v326_v2 }
   0x8   :  { %309 = vmatprep.subr.bf16.mxu1 %v336_v0  ;;  %283 = vmatprep.subr.bf16.mxu0 %v336_v0 }
   0xb   :  { %317 = vmatpush3.bf16.msra.mxu1 %v327_v3  ;;  %284 = vmatpush3.bf16.msra.mxu0 %v327_v3 }
   0xc   :  { %310 = vmatprep.subr.bf16.mxu1 %v336_v0  ;;  %285 = vmatprep.subr.bf16.mxu0 %v336_v0 }
   0xf   :  { %318 = vmatpush3.bf16.msra.mxu1 %v328_v4  ;;  %286 = vmatpush3.bf16.msra.mxu0 %v328_v4 }
  0x10   :  { %311 = vmatprep.subr.bf16.mxu1 %v336_v0  ;;  %287 = vmatprep.subr.bf16.mxu0 %v336_v0 }
  0x13   :  { %319 = vmatpush3.bf16.msra.mxu1 %v329_v5  ;;  %288 = vmatpush3.bf16.msra.mxu0 %v329_v5 }
  0x14   :  { %312 = vmatprep.subr.bf16.mxu1 %v336_v0  ;;  %289 = vmatprep.subr.bf16.mxu0 %v336_v0 }
  0x17   :  { %320 = vmatpush3.bf16.msra.mxu1 %v330_v6  ;;  %290 = vmatpush3.bf16.msra.mxu0 %v330_v6 }
  0x18   :  { %313 = vmatprep.subr.bf16.mxu1 %v336_v0  ;;  %291 = vmatprep.subr.bf16.mxu0 %v336_v0 }
  0x1b   :  { %321 = vmatpush3.bf16.msra.mxu1 %v331_v7  ;;  %292 = vmatpush3.bf16.msra.mxu0 %v331_v7 }
  0x1c   :  { %314 = vmatprep.subr.bf16.mxu1 %v336_v0  ;;  %293 = vmatprep.subr.bf16.mxu0 %v336_v0 }
  0x1f   :  { %322 = vmatpush3.bf16.msra.mxu1 %v332_v8  ;;  %294 = vmatpush3.bf16.msra.mxu0 %v332_v8 }
  0x22   :  { %300 = vmatmul.mubr.bf16.vlgmr.msra.gmra.mrb[0].mxu1 %v333_v9  ;;  %296 = vmatmul.mubr.bf16.vlgmr.msra.gmra.mrb[0].mxu0 %v334_v10 }
  0x23   :  { %303 = vmatprep.mubr.msk.bf16.mxu1 %vm337_vm0, %v336_v0 }
  0x2a   :  { %304 = vmatmul.mubr.bf16.gmra.mrb[4].mxu1 %v335_v11 }
  0xf5   :  { %v158_v12 = vpop.f32.mrb[0].mxu1  ;;  %v150_v13 = vpop.f32.mrb[0].mxu0 }
  0xf6   :  { %v301_v14 = vpop.f32.mrb[1].mxu1  ;;  %v297_v15 = vpop.f32.mrb[1].mxu0 }
  0xf7   :  { %v161_v16 = vpop.f32.mrb[2].mxu1  ;;  %v153_v17 = vpop.f32.mrb[2].mxu0 }
  0xf8   :  { %v259_v18 = vpack.c.bf16 %v161_v16, %v158_v12  ;;  %v302_v19 = vpop.f32.mrb[3].mxu1  ;;  %v254_v20 = vpack.c.bf16 %v153_v17, %v150_v13  ;;  %v298_v21 = vpop.f32.mrb[3].mxu0 }
  0xfa   :  { %266 = vst [vmem:[%s400_s2 + $0x8] sm:$0xff] %v259_v18   ;;  %255 = vst [vmem:[%s400_s2] sm:$0xff] %v254_v20  }
  0xfd   :  { %v166_v22 = vpop.f32.mrb[4].mxu1 }
  0xfe   :  { %v305_v23 = vpop.f32.mrb[5].mxu1 }
  0xff   :  { %v169_v24 = vpop.f32.mrb[6].mxu1 }
 0x100   :  { %v264_v25 = vpack.c.bf16 %v169_v24, %v166_v22  ;;  %v306_v26 = vpop.f32.mrb[7].mxu1 }
 0x102   :  { %267 = vst [vmem:[%s400_s2 + $0x10] sm:$0xff] %v264_v25  }

// kernel: sparse_axial_causal_attention.5
= control target key start
LH: loop header
LB: loop body
LE: loop exit
PB: predicated region body
PF: predicated region fallthrough
CT: control target
= control target key end

     0   :  { %v283_v0 = vmov 0.0   ;;  %vm284_vm0 = vmmov 0   ;;  %s354_s1 = inlined_call_operand.vmem [shape: bf16[128,128], index: 1, kind: input, shape index: {}]   ;;  %s355_s0 = inlined_call_operand.vmem [shape: bf16[48,128], index: 0, kind: input, shape index: {}]   ;;  %s356_s2 = inlined_call_operand.vmem [shape: f32[48,128], index: 2, kind: output, shape index: {}]  }
   0x1   :  { %254 = vmatprep.subr.bf16.mxu1 %v283_v0  ;;  %v272_v1 = vld [vmem:[%s354_s1] sm:$0xff]   ;;  %226 = vmatprep.subr.bf16.mxu0 %v283_v0  ;;  %v273_v2 = vld [vmem:[%s354_s1 + $0x8] sm:$0xff]   ;;  %v274_v3 = vld [vmem:[%s354_s1 + $0x10] sm:$0xff]  }
   0x2   :  { %246 = vmatprep.mubr.msk.bf16.mxu1 %vm284_vm0, %v283_v0  ;;  %242 = vmatprep.mubr.msk.bf16.mxu0 %vm284_vm0, %v283_v0  ;;  %v275_v4 = vld [vmem:[%s354_s1 + $0x18] sm:$0xff]   ;;  %v276_v5 = vld [vmem:[%s354_s1 + $0x20] sm:$0xff]   ;;  %v277_v6 = vld [vmem:[%s354_s1 + $0x28] sm:$0xff]  }
   0x3   :  { %262 = vmatpush3.bf16.msra.mxu1 %v272_v1  ;;  %227 = vmatpush3.bf16.msra.mxu0 %v272_v1  ;;  %v278_v7 = vld [vmem:[%s354_s1 + $0x30] sm:$0xff]   ;;  %v279_v8 = vld [vmem:[%s354_s1 + $0x38] sm:$0xff]   ;;  %v280_v9 = vld [vmem:[%s355_s0 + $0x8] sm:$0xff]  }
   0x4   :  { %255 = vmatprep.subr.bf16.mxu1 %v283_v0  ;;  %228 = vmatprep.subr.bf16.mxu0 %v283_v0  ;;  %v281_v10 = vld [vmem:[%s355_s0] sm:$0xff]   ;;  %v282_v11 = vld [vmem:[%s355_s0 + $0x10] sm:$0xff]  }
   0x7   :  { %263 = vmatpush3.bf16.msra.mxu1 %v273_v2  ;;  %229 = vmatpush3.bf16.msra.mxu0 %v273_v2 }
   0x8   :  { %256 = vmatprep.subr.bf16.mxu1 %v283_v0  ;;  %230 = vmatprep.subr.bf16.mxu0 %v283_v0 }
   0xb   :  { %264 = vmatpush3.bf16.msra.mxu1 %v274_v3  ;;  %231 = vmatpush3.bf16.msra.mxu0 %v274_v3 }
   0xc   :  { %257 = vmatprep.subr.bf16.mxu1 %v283_v0  ;;  %232 = vmatprep.subr.bf16.mxu0 %v283_v0 }
   0xf   :  { %265 = vmatpush3.bf16.msra.mxu1 %v275_v4  ;;  %233 = vmatpush3.bf16.msra.mxu0 %v275_v4 }
  0x10   :  { %258 = vmatprep.subr.bf16.mxu1 %v283_v0  ;;  %234 = vmatprep.subr.bf16.mxu0 %v283_v0 }
  0x13   :  { %266 = vmatpush3.bf16.msra.mxu1 %v276_v5  ;;  %235 = vmatpush3.bf16.msra.mxu0 %v276_v5 }
  0x14   :  { %259 = vmatprep.subr.bf16.mxu1 %v283_v0  ;;  %236 = vmatprep.subr.bf16.mxu0 %v283_v0 }
  0x17   :  { %267 = vmatpush3.bf16.msra.mxu1 %v277_v6  ;;  %237 = vmatpush3.bf16.msra.mxu0 %v277_v6 }
  0x18   :  { %260 = vmatprep.subr.bf16.mxu1 %v283_v0  ;;  %238 = vmatprep.subr.bf16.mxu0 %v283_v0 }
  0x1b   :  { %268 = vmatpush3.bf16.msra.mxu1 %v278_v7  ;;  %239 = vmatpush3.bf16.msra.mxu0 %v278_v7 }
  0x1c   :  { %261 = vmatprep.subr.bf16.mxu1 %v283_v0  ;;  %240 = vmatprep.subr.bf16.mxu0 %v283_v0 }
  0x1f   :  { %269 = vmatpush3.bf16.msra.mxu1 %v279_v8  ;;  %241 = vmatpush3.bf16.msra.mxu0 %v279_v8 }
  0x22   :  { %247 = vmatmul.mubr.bf16.vlgmr.msra.gmra.mrb[0].mxu1 %v280_v9  ;;  %243 = vmatmul.mubr.bf16.vlgmr.msra.gmra.mrb[0].mxu0 %v281_v10 }
  0x23   :  { %250 = vmatprep.mubr.msk.bf16.mxu1 %vm284_vm0, %v283_v0 }
  0x2a   :  { %251 = vmatmul.mubr.bf16.gmra.mrb[4].mxu1 %v282_v11 }
  0xf5   :  { %v158_v12 = vpop.f32.mrb[0].mxu1  ;;  %v150_v13 = vpop.f32.mrb[0].mxu0 }
  0xf6   :  { %196 = vst [vmem:[%s356_s2 + $0x10] sm:$0xff] %v158_v12  ;;  %v248_v14 = vpop.f32.mrb[1].mxu1  ;;  %194 = vst [vmem:[%s356_s2] sm:$0xff] %v150_v13  ;;  %v244_v15 = vpop.f32.mrb[1].mxu0 }
  0xf7   :  { %v161_v16 = vpop.f32.mrb[2].mxu1  ;;  %v153_v17 = vpop.f32.mrb[2].mxu0 }
  0xf8   :  { %197 = vst [vmem:[%s356_s2 + $0x18] sm:$0xff] %v161_v16  ;;  %v249_v18 = vpop.f32.mrb[3].mxu1  ;;  %195 = vst [vmem:[%s356_s2 + $0x8] sm:$0xff] %v153_v17  ;;  %v245_v19 = vpop.f32.mrb[3].mxu0 }
  0xfd   :  { %v166_v20 = vpop.f32.mrb[4].mxu1 }
  0xfe   :  { %198 = vst [vmem:[%s356_s2 + $0x20] sm:$0xff] %v166_v20  ;;  %v252_v21 = vpop.f32.mrb[5].mxu1 }
  0xff   :  { %v169_v22 = vpop.f32.mrb[6].mxu1 }
 0x100   :  { %199 = vst [vmem:[%s356_s2 + $0x28] sm:$0xff] %v169_v22  ;;  %v253_v23 = vpop.f32.mrb[7].mxu1 }

// kernel: sparse_axial_causal_attention.4
= control target key start
LH: loop header
LB: loop body
LE: loop exit
PB: predicated region body
PF: predicated region fallthrough
CT: control target
= control target key end

     0   :  { %vm184_vm0 = vcmask 130048   ;;  %v55_v24 = vlaneseq  ;;  %v1513_v30 = vmov 1966171168   ;;  %vm1514_vm3 = vmmov 1   ;;  %s1520_s10 = smov 64   ;;  %s1521_s11 = smov 16   ;;  %s1872_s1 = inlined_call_operand.vmem [shape: bf16[4,24,16], index: 1, kind: input, shape index: {}]   ;;  %s1873_s0 = inlined_call_operand.vmem [shape: bf16[4,24,16], index: 0, kind: input, shape index: {}]   ;;  %s1874_s3 = inlined_call_operand.vmem [shape: f32[4,24], index: 3, kind: input, shape index: {}]   ;;  %s1875_s2 = inlined_call_operand.vmem [shape: bf16[4,24,16], index: 2, kind: input, shape index: {}]   ;;  %s1876_s4 = inlined_call_operand.vmem [shape: bf16[4,384], index: 4, kind: output, shape index: {}]  }
   0x1   :  { %v1441_v0 = vld [vmem:[%s1872_s1] sm:$0xff]   ;;  %v1442_v1 = vld [vmem:[%s1872_s1 + $0xc] sm:$0xff]   ;;  %v1443_v3 = vld [vmem:[%s1872_s1 + $0x8] ss:$0 sps:$4 sm:$0xff]   ;;  %v115_v31 = vunpack.c.l.s4 %v1513_v30  ;;  %v1515_v46 = vmov 0   ;;  %s1522_s12 = smov 96  }
   0x2   :  { %1381 = vmatprep.subr.msk.bf16.mxu0 %vm184_vm0, %v1441_v0  ;;  %v192_v2 = vsel %vm184_vm0, %v1441_v0, 0  ;;  %v1445_v4 = vld [vmem:[%s1873_s0] sm:$0xff]   ;;  %1383 = vmatprep.subr.msk.bf16.mxu1 %vm184_vm0, %v1442_v1  ;;  %v268_v5 = vsel %vm184_vm0, %v1442_v1, 0  ;;  %v1444_v6 = vld [vmem:[%s1872_s1 + $0x14] ss:$0 sps:$4 sm:$0xff]   ;;  %v1446_v7 = vld [vmem:[%s1873_s0 + $0xc] sm:$0xff]  }
   0x3   :  { %1318 = vmatpush3.bf16.xpose.msra.mxu0 %v192_v2  ;;  %1326 = vmatpush3.bf16.xpose.msra.mxu1 %v268_v5  ;;  %v195_v8 = vsel %vm184_vm0, %v1443_v3, 0  ;;  %v1449_v9 = vld [vmem:[%s1872_s1 + $0x18] sm:$0xff]   ;;  %v271_v10 = vsel %vm184_vm0, %v1444_v6, 0  ;;  %v1450_v11 = vld [vmem:[%s1872_s1 + $0x24] sm:$0xff]   ;;  %v1448_v13 = vld [vmem:[%s1873_s0 + $0x14] ss:$0 sps:$4 sm:$0xff]   ;;  %v116_v33 = vunpack.c.0.s8 %v115_v31 }
   0x4   :  { %1382 = vmatprep.subr.msk.bf16.mxu0 %vm184_vm0, %v1443_v3  ;;  %1384 = vmatprep.subr.msk.bf16.mxu1 %vm184_vm0, %v1444_v6  ;;  %v1447_v12 = vld [vmem:[%s1873_s0 + $0x8] ss:$0 sps:$4 sm:$0xff]   ;;  %v344_v14 = vsel %vm184_vm0, %v1449_v9, 0  ;;  %v1451_v15 = vld [vmem:[%s1872_s1 + $0x20] ss:$0 sps:$4 sm:$0xff]   ;;  %v420_v16 = vsel %vm184_vm0, %v1450_v11, 0 }
   0x5   :  { %1321 = vmatprep.mubr.msk.bf16.mxu0 %vm184_vm0, %v1445_v4  ;;  %1329 = vmatprep.mubr.msk.bf16.mxu1 %vm184_vm0, %v1446_v7  ;;  %v1452_v17 = vld [vmem:[%s1872_s1 + $0x2c] ss:$0 sps:$4 sm:$0xff]   ;;  %v1453_v18 = vld [vmem:[%s1873_s0 + $0x18] sm:$0xff]   ;;  %v1455_v19 = vld [vmem:[%s1873_s0 + $0x24] sm:$0xff]   ;;  %v347_v20 = vsel %vm184_vm0, %v1451_v15, 0  ;;  %v1623_v25 = vshrl.u32 %v55_v24, 7 }
   0x6   :  { %v423_v21 = vsel %vm184_vm0, %v1452_v17, 0  ;;  %v1454_v22 = vld [vmem:[%s1873_s0 + $0x20] ss:$0 sps:$4 sm:$0xff]   ;;  %v1456_v23 = vld [vmem:[%s1873_s0 + $0x2c] ss:$0 sps:$4 sm:$0xff]   ;;  %v60_v26 = vand.u32 127, %v55_v24 }
   0x7   :  { %v58_v27 = vadd.s32 16, %v1623_v25  ;;  %v1243_v36 = vld.sshfl [vmem:[%s1874_s3] sm:$0x33 pattern:$0x75316420]  ;;  %v119_v37 = vsub.s32 %v116_v33, %v1623_v25  ;;  %v57_v38 = vadd.s32 8, %v1623_v25 }
   0x8   :  { %v1242_v29 = vadd.s32 4294967288, %v60_v26  ;;  %vm64_vm1 = vcmp.lt.s32.totalorder %v60_v26, 8  ;;  %v113_v39 = vcombine.high %v1243_v36, %v1243_v36  ;;  %v138_v41 = vsub.s32 0, %v1623_v25  ;;  %s1523_s13 = smov 48   ;;  %s1524_s14 = smov 80  }
   0x9   :  { %v1241_v28 = vadd.s32 4294967288, %v58_v27  ;;  %vm1627_vm4 = vmxor %vm64_vm1, %vm1514_vm3  ;;  %vm67_vm5 = vcmp.le.s32.totalorder %v60_v26, %v58_v27  ;;  %v120_v40 = vrot.slane %v1243_v36, %v119_v37  ;;  %vm66_vm9 = vcmp.le.s32.totalorder %v60_v26, %v57_v38  ;;  %s1525_s15 = smov 112  }
   0xa   :  { %v84_v35 = vxor.u32 %v1242_v29, %v1623_v25  ;;  %v127_v42 = vrot.slane %v113_v39, %v119_v37  ;;  %vm65_vm11 = vcmp.le.s32.totalorder %v60_v26, %v1623_v25 }
   0xb   :  { %1320 = vmatpush3.bf16.xpose.msra.mxu0 %v195_v8  ;;  %1328 = vmatpush3.bf16.xpose.msra.mxu1 %v271_v10  ;;  %v85_v32 = vxor.u32 %v1242_v29, %v1241_v28  ;;  %v139_v43 = vrot.slane %v120_v40, %v138_v41  ;;  %vm1645_vm14 = vmand %vm64_vm1, %vm65_vm11 }
   0xc   :  { %1385 = vmatprep.subr.msk.bf16.mxu0 %vm184_vm0, %v1449_v9  ;;  %1387 = vmatprep.subr.msk.bf16.mxu1 %vm184_vm0, %v1450_v11  ;;  %vm87_vm7 = vcmp.lt.s32.totalorder %v84_v35, 4  ;;  %v143_v44 = vrot.slane %v127_v42, %v138_v41  ;;  %v128_v9 = vcombine.high %v120_v40, %v120_v40  ;;  %v129_v10 = vcombine.high %v127_v42, %v127_v42 }
   0xd   :  { %vm88_vm2 = vcmp.lt.s32.totalorder %v85_v32, 4  ;;  %vm94_vm10 = vmand %vm1627_vm4, %vm87_vm7  ;;  %vm1190_vm7 = vcmask 523264  }
   0xe   :  { %vm95_vm6 = vmand %vm1627_vm4, %vm88_vm2  ;;  %vm491_vm2 = vcmask 195584   ;;  %v147_v11 = vrot.slane %v128_v9, %v138_v41  ;;  %vm647_vm4 = vcmask 1043456  }
   0xf   :  { %vm98_vm8 = vmand %vm95_vm6, %vm67_vm5  ;;  %vm1186_vm5 = vcmask 261120   ;;  %vm1188_vm6 = vcmask 392192  }
  0x10   :  { %vm104_vm12 = vmor %vm64_vm1, %vm98_vm8  ;;  %vm1192_vm8 = vcmask 654336  }
  0x11   :  { %vm97_vm13 = vmand %vm94_vm10, %vm66_vm9  ;;  %v1649_v47 = vsel %vm104_vm12, 1, %v1515_v46  ;;  %vm1194_vm9 = vcmask 785408  }
  0x12   :  { %1322 = vmatmul.mubr.msk.bf16.vlgmr.msra.gmra.mrb[0].mxu0 %vm184_vm0, %v1447_v12  ;;  %1330 = vmatmul.mubr.msk.bf16.vlgmr.msra.gmra.mrb[0].mxu1 %vm184_vm0, %v1448_v13  ;;  %vm103_vm15 = vmor %vm64_vm1, %vm97_vm13  ;;  %vm478_vm3 = vcmp.eq.s32.totalorder %v1649_v47, 1 }
  0x13   :  { %1334 = vmatpush3.bf16.xpose.msra.mxu0 %v344_v14  ;;  %1342 = vmatpush3.bf16.xpose.msra.mxu1 %v420_v16  ;;  %v474_v56 = vsel %vm103_vm15, 1, %v1515_v46  ;;  %v151_v14 = vrot.slane %v129_v10, %v138_v41 }
  0x14   :  { %1386 = vmatprep.subr.msk.bf16.mxu0 %vm184_vm0, %v1451_v15  ;;  %1388 = vmatprep.subr.msk.bf16.mxu1 %vm184_vm0, %v1452_v17  ;;  %vm477_vm1 = vcmp.eq.s32.totalorder %v474_v56, 1 }
  0x15   :  { %1337 = vmatprep.mubr.msk.bf16.mxu0 %vm184_vm0, %v1453_v18  ;;  %1345 = vmatprep.mubr.msk.bf16.mxu1 %vm184_vm0, %v1455_v19 }
  0x1b   :  { %1336 = vmatpush3.bf16.xpose.msra.mxu0 %v347_v20  ;;  %1344 = vmatpush3.bf16.xpose.msra.mxu1 %v423_v21 }
  0x22   :  { %1338 = vmatmul.mubr.msk.bf16.vlgmr.msra.gmra.mrb[4].mxu0 %vm184_vm0, %v1454_v22  ;;  %1346 = vmatmul.mubr.msk.bf16.vlgmr.msra.gmra.mrb[4].mxu1 %vm184_vm0, %v1456_v23 }
  0xe5   :  { %v1323_v48 = vpop.f32.mrb[0].mxu0  ;;  %v1331_v50 = vpop.f32.mrb[0].mxu1 }
  0xe6   :  { %v240_v49 = vadd.f32 %v1323_v48, %v139_v43  ;;  %v231_v51 = vpop.f32.mrb[1].mxu0  ;;  %v316_v52 = vadd.f32 %v1331_v50, %v143_v44  ;;  %v307_v54 = vpop.f32.mrb[1].mxu1 }
  0xe7   :  { %v1655_v53 = vsel %vm1645_vm14, %v231_v51, -3.4028235e+38  ;;  %v1324_v55 = vpop.f32.mrb[2].mxu0  ;;  %v482_v57 = vsel %vm1645_vm14, %v307_v54, -3.4028235e+38  ;;  %v1332_v59 = vpop.f32.mrb[2].mxu1 }
  0xe8   :  { %v234_v58 = vpop.f32.mrb[3].mxu0  ;;  %v492_v60 = vsel %vm491_vm2, %v1655_v53, -inf  ;;  %v501_v62 = vsel %vm491_vm2, %v482_v57, -inf  ;;  %v310_v63 = vpop.f32.mrb[3].mxu1  ;;  %v484_v0 = vsel %vm478_vm3, %v316_v52, -3.4028235e+38 }
  0xe9   :  { %v235_v61 = vadd.f32 %v234_v58, %v139_v43  ;;  %493 = vmax.xlane.f32.xlu0 %v492_v60  ;;  %v481_v1 = vsel %vm478_vm3, %v240_v49, -3.4028235e+38  ;;  %502 = vmax.xlane.f32.xlu1 %v501_v62  ;;  %v311_v2 = vadd.f32 %v310_v63, %v143_v44  ;;  %v507_v3 = vsel %vm491_vm2, %v484_v0, -inf }
  0xea   :  { %v498_v4 = vsel %vm491_vm2, %v481_v1, -inf }
  0xeb   :  { %v480_v5 = vsel %vm477_vm1, %v235_v61, -3.4028235e+38  ;;  %v483_v6 = vsel %vm477_vm1, %v311_v2, -3.4028235e+38 }
  0xec   :  { %v495_v7 = vsel %vm491_vm2, %v480_v5, -inf  ;;  %v504_v8 = vsel %vm491_vm2, %v483_v6, -inf }
  0xed   :  { %499 = vmax.xlane.f32.xlu0 %v498_v4  ;;  %508 = vmax.xlane.f32.xlu1 %v507_v3 }
  0xf1   :  { %496 = vmax.xlane.f32.xlu0 %v495_v7  ;;  %505 = vmax.xlane.f32.xlu1 %v504_v8 }
  0xf5   :  { %v1339_v12 = vpop.f32.mrb[4].mxu0  ;;  %v1347_v15 = vpop.f32.mrb[4].mxu1 }
  0xf6   :  { %v383_v13 = vpop.f32.mrb[5].mxu0  ;;  %v459_v18 = vpop.f32.mrb[5].mxu1  ;;  %v392_v23 = vadd.f32 %v1339_v12, %v147_v11  ;;  %v468_v31 = vadd.f32 %v1347_v15, %v151_v14 }
  0xf7   :  { %v485_v16 = vsel %vm1645_vm14, %v383_v13, -3.4028235e+38  ;;  %v1340_v17 = vpop.f32.mrb[6].mxu0  ;;  %v1676_v19 = vsel %vm1645_vm14, %v459_v18, -3.4028235e+38  ;;  %v1348_v21 = vpop.f32.mrb[6].mxu1 }
  0xf8   :  { %v386_v20 = vpop.f32.mrb[7].mxu0  ;;  %v510_v22 = vsel %vm491_vm2, %v485_v16, -inf  ;;  %v462_v26 = vpop.f32.mrb[7].mxu1  ;;  %v519_v28 = vsel %vm491_vm2, %v1676_v19, -inf  ;;  %v1688_v33 = vsel %vm478_vm3, %v392_v23, -3.4028235e+38 }
  0xf9   :  { %v387_v24 = vadd.f32 %v386_v20, %v147_v11  ;;  %511 = vmax.xlane.f32.xlu0 %v510_v22  ;;  %v463_v27 = vadd.f32 %v462_v26, %v151_v14  ;;  %v516_v35 = vsel %vm491_vm2, %v1688_v33, -inf  ;;  %v1696_v36 = vsel %vm478_vm3, %v468_v31, -3.4028235e+38 }
  0xfa   :  { %v525_v37 = vsel %vm491_vm2, %v1696_v36, -inf }
  0xfb   :  { %v486_v29 = vsel %vm477_vm1, %v387_v24, -3.4028235e+38  ;;  %v1684_v32 = vsel %vm477_vm1, %v463_v27, -3.4028235e+38 }
  0xfc   :  { %v513_v30 = vsel %vm491_vm2, %v486_v29, -inf  ;;  %v522_v34 = vsel %vm491_vm2, %v1684_v32, -inf }
  0xfd   :  { %514 = vmax.xlane.f32.xlu1 %v513_v30  ;;  %520 = vmax.xlane.f32.xlu0 %v519_v28 }
 0x101   :  { %523 = vmax.xlane.f32.xlu1 %v522_v34  ;;  %517 = vmax.xlane.f32.xlu0 %v516_v35  ;;  %v1457_v35 = vld [vmem:[%s1875_s2] sm:$0xff]  }
 0x102   :  { %1349 = vmatprep.subr.bf16.mxu0 %v1457_v35 }
 0x103   :  { %1350 = vmatpush3.bf16.msra.mxu0 %v1457_v35 }
 0x105   :  { %526 = vmax.xlane.f32.xlu1 %v525_v37  ;;  %v1459_v37 = vld [vmem:[%s1875_s2 + $0xc] sm:$0xff]  }
 0x106   :  { %1357 = vmatprep.subr.bf16.mxu1 %v1459_v37 }
 0x107   :  { %1358 = vmatpush3.bf16.msra.mxu1 %v1459_v37  ;;  %v1516_v37 = vmov 1983009808  }
 0x176   :  { %v494_v38 = vpop.xlane.xlu0 %493  ;;  %v503_v39 = vpop.xlane.xlu1 %502 }
 0x177   :  { %v528_v40 = vsub.f32 %v1655_v53, %v494_v38  ;;  %v531_v41 = vsub.f32 %v482_v57, %v503_v39  ;;  %v1460_v39 = vld [vmem:[%s1875_s2 + $0x14] ss:$0 sps:$4 sm:$0xff]  }
 0x178   :  { %1390 = vmatprep.subr.msk.bf16.mxu1 %vm647_vm4, %v1460_v39 }
 0x179   :  { %v540_v42 = vmul.f32 1.442695, %v528_v40  ;;  %v546_v43 = vmul.f32 1.442695, %v531_v41  ;;  %v715_v40 = vsel %vm647_vm4, %v1460_v39, 0  ;;  %v1461_v41 = vld [vmem:[%s1875_s2 + $0x18] sm:$0xff]  }
 0x17a   :  { %v500_v44 = vpop.xlane.xlu0 %499  ;;  %v509_v45 = vpop.xlane.xlu1 %508  ;;  %1360 = vmatpush3.bf16.msra.mxu1 %v715_v40  ;;  %v1517_v40 = vmov 1934713408  }
 0x17b   :  { %1465 = vpow2.f32 %v540_v42  ;;  %v530_v46 = vsub.f32 %v481_v1, %v500_v44  ;;  %v533_v48 = vsub.f32 %v484_v0, %v509_v45  ;;  %v1462_v42 = vld [vmem:[%s1875_s2 + $0x24] sm:$0xff]  }
 0x17c   :  { %1467 = vpow2.f32 %v546_v43  ;;  %1373 = vmatprep.subr.bf16.mxu1 %v1462_v42 }
 0x17d   :  { %v544_v47 = vmul.f32 1.442695, %v530_v46  ;;  %v550_v49 = vmul.f32 1.442695, %v533_v48 }
 0x17e   :  { %v497_v50 = vpop.xlane.xlu0 %496  ;;  %v506_v51 = vpop.xlane.xlu1 %505 }
 0x17f   :  { %v529_v52 = vsub.f32 %v480_v5, %v497_v50  ;;  %1469 = vpow2.f32 %v550_v49  ;;  %v532_v54 = vsub.f32 %v483_v6, %v506_v51 }
 0x180   :  { %1471 = vpow2.f32 %v544_v47 }
 0x181   :  { %v542_v55 = vmul.f32 1.442695, %v529_v52  ;;  %v548_v56 = vmul.f32 1.442695, %v532_v54 }
 0x183   :  { %1473 = vpow2.f32 %v542_v55 }
 0x184   :  { %1475 = vpow2.f32 %v548_v56 }
 0x185   :  { %v1701_v53 = vpop.eup %1465 }
 0x186   :  { %v512_v57 = vpop.xlane.xlu0 %511  ;;  %v564_v58 = vsel %vm491_vm2, %v1701_v53, 0.0  ;;  %v1705_v59 = vpop.eup %1467 }
 0x187   :  { %v534_v60 = vsub.f32 %v485_v16, %v512_v57  ;;  %565 = vadd.xlane.f32.xlu0 %v564_v58  ;;  %v573_v1 = vsel %vm491_vm2, %v1705_v59, 0.0 }
 0x189   :  { %v552_v61 = vmul.f32 1.442695, %v534_v60  ;;  %v1707_v62 = vpop.eup %1469 }
 0x18a   :  { %v515_v63 = vpop.xlane.xlu1 %514  ;;  %v521_v0 = vpop.xlane.xlu0 %520  ;;  %v579_v5 = vsel %vm491_vm2, %v1707_v62, 0.0 }
 0x18b   :  { %v1711_v2 = vpop.eup %1471  ;;  %1477 = vpow2.f32 %v552_v61  ;;  %v535_v3 = vsub.f32 %v486_v29, %v515_v63  ;;  %v537_v4 = vsub.f32 %v1676_v19, %v521_v0  ;;  %574 = vadd.xlane.f32.xlu0 %v573_v1  ;;  %580 = vadd.xlane.f32.xlu1 %v579_v5 }
 0x18c   :  { %v570_v11 = vsel %vm491_vm2, %v1711_v2, 0.0 }
 0x18d   :  { %v1716_v6 = vpop.eup %1473  ;;  %v554_v7 = vmul.f32 1.442695, %v535_v3  ;;  %v558_v8 = vmul.f32 1.442695, %v537_v4 }
 0x18e   :  { %v524_v9 = vpop.xlane.xlu1 %523  ;;  %v518_v10 = vpop.xlane.xlu0 %517  ;;  %v567_v12 = vsel %vm491_vm2, %v1716_v6, 0.0 }
 0x18f   :  { %1479 = vpow2.f32 %v554_v7  ;;  %v538_v13 = vsub.f32 %v1684_v32, %v524_v9  ;;  %v536_v14 = vsub.f32 %v1688_v33, %v518_v10  ;;  %571 = vadd.xlane.f32.xlu0 %v570_v11  ;;  %v1724_v15 = vpop.eup %1475  ;;  %568 = vadd.xlane.f32.xlu1 %v567_v12  ;;  %v1464_v10 = vld [vmem:[%s1875_s2 + $0x2c] ss:$0 sps:$4 sm:$0xff]  }
 0x190   :  { %1481 = vpow2.f32 %v558_v8  ;;  %v576_v20 = vsel %vm491_vm2, %v1724_v15, 0.0 }
 0x191   :  { %v560_v16 = vmul.f32 1.442695, %v538_v13  ;;  %v556_v17 = vmul.f32 1.442695, %v536_v14  ;;  %v847_v14 = vsel %vm647_vm4, %v1464_v10, 0 }
 0x192   :  { %v527_v18 = vpop.xlane.xlu1 %526 }
 0x193   :  { %1483 = vpow2.f32 %v560_v16  ;;  %v539_v19 = vsub.f32 %v1696_v36, %v527_v18  ;;  %577 = vadd.xlane.f32.xlu1 %v576_v20  ;;  %v1458_v36 = vld [vmem:[%s1875_s2 + $0x8] ss:$0 sps:$4 sm:$0xff]  }
 0x194   :  { %1485 = vpow2.f32 %v556_v17  ;;  %1389 = vmatprep.subr.msk.bf16.mxu0 %vm647_vm4, %v1458_v36  ;;  %v649_v38 = vsel %vm647_vm4, %v1458_v36, 0 }
 0x195   :  { %v1729_v21 = vpop.eup %1477  ;;  %v562_v22 = vmul.f32 1.442695, %v539_v19  ;;  %1352 = vmatpush3.bf16.msra.mxu0 %v649_v38  ;;  %v900_v38 = vunpack.c.l.s4 %v1516_v37 }
 0x196   :  { %v582_v23 = vsel %vm491_vm2, %v1729_v21, 0.0  ;;  %1365 = vmatprep.subr.bf16.mxu0 %v1461_v41 }
 0x197   :  { %1487 = vpow2.f32 %v562_v22  ;;  %583 = vadd.xlane.f32.xlu0 %v582_v23  ;;  %v901_v39 = vunpack.c.0.s8 %v900_v38 }
 0x199   :  { %v1733_v24 = vpop.eup %1479 }
 0x19a   :  { %v1735_v26 = vpop.eup %1481  ;;  %v585_v27 = vsel %vm491_vm2, %v1733_v24, 0.0 }
 0x19b   :  { %586 = vadd.xlane.f32.xlu1 %v585_v27  ;;  %v591_v28 = vsel %vm491_vm2, %v1735_v26, 0.0 }
 0x19c   :  { %592 = vadd.xlane.f32.xlu0 %v591_v28 }
 0x19d   :  { %v1741_v29 = vpop.eup %1483 }
 0x19e   :  { %v1743_v30 = vpop.eup %1485  ;;  %v594_v31 = vsel %vm491_vm2, %v1741_v29, 0.0 }
 0x19f   :  { %595 = vadd.xlane.f32.xlu1 %v594_v31  ;;  %v588_v32 = vsel %vm491_vm2, %v1743_v30, 0.0 }
 0x1a0   :  { %589 = vadd.xlane.f32.xlu0 %v588_v32 }
 0x1a1   :  { %v1749_v33 = vpop.eup %1487 }
 0x1a2   :  { %v597_v34 = vsel %vm491_vm2, %v1749_v33, 0.0 }
 0x1a3   :  { %598 = vadd.xlane.f32.xlu1 %v597_v34 }
 0x214   :  { %v566_v43 = vpop.xlane.xlu0 %565 }
 0x215   :  { %1489 = vrcp.f32 %v566_v43 }
 0x218   :  { %v575_v44 = vpop.xlane.xlu0 %574  ;;  %v581_v45 = vpop.xlane.xlu1 %580 }
 0x21c   :  { %v572_v46 = vpop.xlane.xlu0 %571  ;;  %v569_v48 = vpop.xlane.xlu1 %568 }
 0x21d   :  { %1491 = vrcp.f32 %v572_v46 }
 0x21e   :  { %1493 = vrcp.f32 %v569_v48 }
 0x21f   :  { %1495 = vrcp.f32 %v581_v45  ;;  %v1490_v50 = vpop.eup %1489  ;;  %v1806_v45 = vsub.s32 %v901_v39, %v1623_v25 }
 0x220   :  { %1497 = vrcp.f32 %v575_v44  ;;  %v578_v47 = vpop.xlane.xlu1 %577  ;;  %v612_v58 = vmul.f32 %v1490_v50, %v1701_v53 }
 0x221   :  { %1499 = vrcp.f32 %v578_v47 }
 0x224   :  { %v584_v49 = vpop.xlane.xlu0 %583 }
 0x225   :  { %1501 = vrcp.f32 %v584_v49 }
 0x227   :  { %v1492_v51 = vpop.eup %1491 }
 0x228   :  { %v1494_v52 = vpop.eup %1493  ;;  %v614_v54 = vmul.f32 %v1492_v51, %v1711_v2  ;;  %v587_v55 = vpop.xlane.xlu1 %586  ;;  %v1463_v2 = vld [vmem:[%s1875_s2 + $0x20] ss:$0 sps:$4 sm:$0xff]   ;;  %s1518_s2 = smov 32  }
 0x229   :  { %v1496_v56 = vpop.eup %1495  ;;  %1503 = vrcp.f32 %v587_v55  ;;  %v593_v57 = vpop.xlane.xlu0 %592  ;;  %v613_v60 = vmul.f32 %v1494_v52, %v1716_v6  ;;  %v781_v9 = vsel %vm647_vm4, %v1463_v2, 0 }
 0x22a   :  { %v1498_v61 = vpop.eup %1497  ;;  %v625_v63 = vpack.c.bf16 %v614_v54, %v614_v54  ;;  %1505 = vrcp.f32 %v593_v57  ;;  %v617_v3 = vmul.f32 %v1496_v56, %v1707_v62 }
 0x22b   :  { %v624_v0 = vpack.c.bf16 %v613_v60, %v612_v58  ;;  %v1500_v1 = vpop.eup %1499  ;;  %v615_v53 = vmul.f32 %v1498_v61, %v1705_v59 }
 0x22c   :  { %v596_v4 = vpop.xlane.xlu1 %595  ;;  %v616_v6 = vmul.f32 %v1500_v1, %v1724_v15  ;;  %v627_v62 = vpack.c.bf16 %v617_v3, %v617_v3 }
 0x22d   :  { %1507 = vrcp.f32 %v596_v4  ;;  %1353 = vmatprep.mubr.msk.bf16.mxu0 %vm491_vm2, %v624_v0  ;;  %v590_v5 = vpop.xlane.xlu0 %589 }
 0x22e   :  { %1509 = vrcp.f32 %v590_v5  ;;  %1354 = vmatmul.mubr.msk.bf16.vlgmr.msra.gmra.mrb[8].mxu0 %vm491_vm2, %v625_v63  ;;  %v626_v7 = vpack.c.bf16 %v616_v6, %v615_v53 }
 0x22f   :  { %1366 = vmatpush3.bf16.msra.mxu0 %v1461_v41  ;;  %v1502_v11 = vpop.eup %1501 }
 0x230   :  { %v599_v8 = vpop.xlane.xlu1 %598  ;;  %1391 = vmatprep.subr.msk.bf16.mxu0 %vm647_vm4, %v1463_v2  ;;  %1361 = vmatprep.mubr.msk.bf16.mxu1 %vm491_vm2, %v626_v7  ;;  %v618_v12 = vmul.f32 %v1502_v11, %v1729_v21 }
 0x231   :  { %1511 = vrcp.f32 %v599_v8  ;;  %1362 = vmatmul.mubr.msk.bf16.vlgmr.msra.gmra.mrb[8].mxu1 %vm491_vm2, %v627_v62 }
 0x232   :  { %1374 = vmatpush3.bf16.msra.mxu1 %v1462_v42 }
 0x233   :  { %v1504_v59 = vpop.eup %1503  ;;  %1368 = vmatpush3.bf16.msra.mxu0 %v781_v9  ;;  %1392 = vmatprep.subr.msk.bf16.mxu1 %vm647_vm4, %v1464_v10 }
 0x234   :  { %v619_v13 = vmul.f32 %v1504_v59, %v1733_v24  ;;  %v1506_v15 = vpop.eup %1505 }
 0x235   :  { %v621_v19 = vmul.f32 %v1506_v15, %v1735_v26 }
 0x236   :  { %v628_v16 = vpack.c.bf16 %v619_v13, %v618_v12  ;;  %1376 = vmatpush3.bf16.msra.mxu1 %v847_v14 }
 0x237   :  { %v1508_v17 = vpop.eup %1507 }
 0x238   :  { %v1510_v18 = vpop.eup %1509  ;;  %1369 = vmatprep.mubr.msk.bf16.mxu0 %vm491_vm2, %v628_v16  ;;  %v622_v20 = vmul.f32 %v1508_v17, %v1741_v29 }
 0x239   :  { %v620_v22 = vmul.f32 %v1510_v18, %v1743_v30 }
 0x23a   :  { %v630_v21 = vpack.c.bf16 %v622_v20, %v621_v19 }
 0x23b   :  { %v1512_v23 = vpop.eup %1511  ;;  %v629_v24 = vpack.c.bf16 %v620_v22, %v620_v22 }
 0x23c   :  { %v623_v27 = vmul.f32 %v1512_v23, %v1749_v33  ;;  %1377 = vmatprep.mubr.msk.bf16.mxu1 %vm491_vm2, %v630_v21  ;;  %v932_v33 = vunpack.c.l.s4 %v1517_v40 }
 0x23d   :  { %1370 = vmatmul.mubr.msk.bf16.vlgmr.msra.gmra.mrb[12].mxu0 %vm491_vm2, %v629_v24 }
 0x23e   :  { %v631_v28 = vpack.c.bf16 %v623_v27, %v623_v27  ;;  %v933_v46 = vunpack.c.0.s8 %v932_v33 }
 0x240   :  { %1378 = vmatmul.mubr.msk.bf16.vlgmr.msra.gmra.mrb[12].mxu1 %vm491_vm2, %v631_v28  ;;  %v1809_v63 = vsub.s32 %v933_v46, %v1623_v25 }
 0x301   :  { %v1355_v31 = vpop.f32.mrb[8].mxu0 }
 0x302   :  { %v685_v32 = vpop.f32.mrb[9].mxu0 }
 0x303   :  { %v1356_v34 = vpop.f32.mrb[10].mxu0 }
 0x304   :  { %v688_v26 = vpop.f32.mrb[11].mxu0  ;;  %v1363_v35 = vpop.f32.mrb[8].mxu1 }
 0x305   :  { %v751_v29 = vpop.f32.mrb[9].mxu1 }
 0x306   :  { %v1364_v36 = vpop.f32.mrb[10].mxu1 }
 0x307   :  { %v754_v30 = vpop.f32.mrb[11].mxu1  ;;  %v1519_v36 = vmov 0.0  }
 0x310   :  { %v1371_v41 = vpop.f32.mrb[12].mxu0 }
 0x311   :  { %v1033_v42 = vcombine.low %v1355_v31, %v1371_v41  ;;  %v1034_v43 = vcombine.high %v1355_v31, %v1371_v41  ;;  %v817_v44 = vpop.f32.mrb[13].mxu0 }
 0x312   :  { %v897_v48 = vcombine.low %v685_v32, %v817_v44  ;;  %v898_v47 = vcombine.high %v685_v32, %v817_v44  ;;  %v1372_v49 = vpop.f32.mrb[14].mxu0 }
 0x313   :  { %v820_v50 = vpop.f32.mrb[15].mxu0  ;;  %v1379_v51 = vpop.f32.mrb[12].mxu1  ;;  %v1041_v0 = vrot.slane %v1033_v42, %v1806_v45  ;;  %v1813_v1 = vrot.slane %v1034_v43, %v1806_v45 }
 0x314   :  { %v965_v52 = vcombine.low %v688_v26, %v820_v50  ;;  %v966_v54 = vcombine.high %v688_v26, %v820_v50  ;;  %v883_v55 = vpop.f32.mrb[13].mxu1  ;;  %v1049_v56 = vcombine.low %v1363_v35, %v1379_v51  ;;  %v1050_v57 = vcombine.high %v1363_v35, %v1379_v51 }
 0x315   :  { %v913_v58 = vcombine.low %v751_v29, %v883_v55  ;;  %v914_v60 = vcombine.high %v751_v29, %v883_v55  ;;  %v1380_v61 = vpop.f32.mrb[14].mxu1  ;;  %v905_v3 = vrot.slane %v897_v48, %v1806_v45  ;;  %v912_v25 = vrot.slane %v898_v47, %v1806_v45 }
 0x316   :  { %v886_v4 = vpop.f32.mrb[15].mxu1  ;;  %v1057_v2 = vrot.slane %v1049_v56, %v1806_v45  ;;  %v1818_v5 = vrot.slane %v1050_v57, %v1806_v45  ;;  %v973_v7 = vrot.slane %v965_v52, %v1806_v45  ;;  %v980_v16 = vrot.slane %v966_v54, %v1806_v45 }
 0x317   :  { %v921_v53 = vrot.slane %v913_v58, %v1806_v45  ;;  %v928_v6 = vrot.slane %v914_v60, %v1806_v45  ;;  %v981_v8 = vcombine.low %v754_v30, %v886_v4  ;;  %v982_v62 = vcombine.high %v754_v30, %v886_v4 }
 0x318   :  { %v1065_v9 = vcombine.low %v1041_v0, %v1057_v2  ;;  %v1066_v10 = vcombine.high %v1041_v0, %v1057_v2  ;;  %v1081_v11 = vcombine.low %v1813_v1, %v1818_v5  ;;  %v1082_v59 = vcombine.high %v1813_v1, %v1818_v5 }
 0x319   :  { %v929_v12 = vcombine.low %v905_v3, %v921_v53  ;;  %v930_v13 = vcombine.high %v905_v3, %v921_v53  ;;  %v945_v14 = vcombine.low %v912_v25, %v928_v6  ;;  %v946_v15 = vcombine.high %v912_v25, %v928_v6 }
 0x31a   :  { %v989_v17 = vrot.slane %v981_v8, %v1806_v45  ;;  %v996_v18 = vrot.slane %v982_v62, %v1806_v45  ;;  %v1080_v19 = vrot.slane %v1066_v10, %v1809_v63  ;;  %v1089_v28 = vrot.slane %v1081_v11, %v1809_v63 }
 0x31b   :  { %v944_v20 = vrot.slane %v930_v13, %v1809_v63  ;;  %v953_v22 = vrot.slane %v945_v14, %v1809_v63  ;;  %v960_v31 = vrot.slane %v946_v15, %v1809_v63  ;;  %v1073_v26 = vrot.slane %v1065_v9, %v1809_v63 }
 0x31c   :  { %v997_v21 = vcombine.low %v973_v7, %v989_v17  ;;  %v998_v23 = vcombine.high %v973_v7, %v989_v17  ;;  %v1013_v24 = vcombine.low %v980_v16, %v996_v18  ;;  %v1014_v27 = vcombine.high %v980_v16, %v996_v18  ;;  %1162 = vrot.lane.b32.xlu1 %v1080_v19, %s1518_s2 }
 0x31d   :  { %v962_v30 = vcombine.high %v944_v20, %v1519_v36  ;;  %v963_v40 = vcombine.high %v953_v22, %v1519_v36  ;;  %v964_v42 = vcombine.high %v960_v31, %v1519_v36  ;;  %v937_v44 = vrot.slane %v929_v12, %v1809_v63 }
 0x31e   :  { %v1012_v32 = vrot.slane %v998_v23, %v1809_v63  ;;  %v1021_v34 = vrot.slane %v1013_v24, %v1809_v63  ;;  %v1028_v35 = vrot.slane %v1014_v27, %v1809_v63  ;;  %v1842_v29 = vrot.slane %v997_v21, %v1809_v63 }
 0x31f   :  { %v1097_v46 = vcombine.high %v1073_v26, %v1519_v36  ;;  %v1098_v51 = vcombine.high %v1080_v19, %v1519_v36  ;;  %v961_v52 = vcombine.high %v937_v44, %v1519_v36  ;;  %v1099_v55 = vcombine.high %v1089_v28, %v1519_v36 }
 0x320   :  { %1170 = vrot.lane.b32.xlu1 %v1089_v28, %s1520_s10  ;;  %v1411_v37 = vpack.i.bf16 %v1021_v34, %v953_v22  ;;  %v1416_v38 = vpack.i.bf16 %v1028_v35, %v960_v31  ;;  %v1030_v39 = vcombine.high %v1012_v32, %v1519_v36  ;;  %v1406_v33 = vpack.i.bf16 %v1012_v32, %v944_v20 }
 0x321   :  { %v1031_v41 = vcombine.high %v1021_v34, %v1519_v36  ;;  %v1032_v43 = vcombine.high %v1028_v35, %v1519_v36  ;;  %v1029_v50 = vcombine.high %v1842_v29, %v1519_v36  ;;  %v1096_v56 = vrot.slane %v1082_v59, %v1809_v63 }
 0x322   :  { %1412 = vrot.lane.b32.xlu0 %v1411_v37, %s1520_s10  ;;  %v1426_v48 = vpack.i.bf16 %v1030_v39, %v962_v30 }
 0x323   :  { %v1431_v47 = vpack.i.bf16 %v1031_v41, %v963_v40  ;;  %v1436_v49 = vpack.i.bf16 %v1032_v43, %v964_v42  ;;  %v1421_v54 = vpack.i.bf16 %v1029_v50, %v961_v52  ;;  %v1100_v57 = vcombine.high %v1096_v56, %v1519_v36 }
 0x324   :  { %1158 = vrot.lane.b32.xlu1 %v1097_v46, %s1521_s11 }
 0x326   :  { %1417 = vrot.lane.b32.xlu0 %v1416_v38, %s1522_s12 }
 0x328   :  { %1166 = vrot.lane.b32.xlu1 %v1098_v51, %s1523_s13 }
 0x32a   :  { %1422 = vrot.lane.b32.xlu0 %v1421_v54, %s1521_s11 }
 0x32c   :  { %1174 = vrot.lane.b32.xlu1 %v1099_v55, %s1524_s14 }
 0x32e   :  { %1427 = vrot.lane.b32.xlu0 %v1426_v48, %s1523_s13 }
 0x330   :  { %1407 = vrot.lane.b32.xlu1 %v1406_v33, %s1518_s2 }
 0x332   :  { %1432 = vrot.lane.b32.xlu0 %v1431_v47, %s1524_s14 }
 0x334   :  { %1178 = vrot.lane.b32.xlu1 %v1096_v56, %s1522_s12 }
 0x336   :  { %1437 = vrot.lane.b32.xlu0 %v1436_v49, %s1525_s15 }
 0x338   :  { %1182 = vrot.lane.b32.xlu1 %v1100_v57, %s1525_s15 }
 0x38e   :  { %v1163_v58 = vpop.permute.xlu1 %1162 }
 0x392   :  { %v1171_v60 = vpop.permute.xlu1 %1170 }
 0x394   :  { %v1413_v61 = vpop.permute.xlu0 %1412 }
 0x395   :  { %v1415_v8 = vunpack.i.h.bf16 %v1413_v61  ;;  %v1414_v15 = vunpack.i.l.bf16 %v1413_v61 }
 0x396   :  { %v1159_v0 = vpop.permute.xlu1 %1158 }
 0x397   :  { %v1205_v5 = vsel %vm184_vm0, %v1073_v26, %v1159_v0 }
 0x398   :  { %v1418_v1 = vpop.permute.xlu0 %1417  ;;  %v1206_v25 = vsel %vm1186_vm5, %v1205_v5, %v1163_v58 }
 0x399   :  { %v1420_v16 = vunpack.i.h.bf16 %v1418_v1  ;;  %v1419_v24 = vunpack.i.l.bf16 %v1418_v1 }
 0x39a   :  { %v1167_v3 = vpop.permute.xlu1 %1166 }
 0x39b   :  { %v1207_v62 = vsel %vm1188_vm6, %v1206_v25, %v1167_v3 }
 0x39c   :  { %v1423_v4 = vpop.permute.xlu0 %1422  ;;  %v1208_v27 = vsel %vm1190_vm7, %v1207_v62, %v1171_v60 }
 0x39d   :  { %v1425_v53 = vunpack.i.h.bf16 %v1423_v4  ;;  %v1424_v6 = vunpack.i.l.bf16 %v1423_v4 }
 0x39e   :  { %v1175_v2 = vpop.permute.xlu1 %1174 }
 0x39f   :  { %v1198_v11 = vsel %vm184_vm0, %v1842_v29, %v1425_v53  ;;  %v1185_v59 = vsel %vm184_vm0, %v937_v44, %v1424_v6  ;;  %v1209_v32 = vsel %vm1192_vm8, %v1208_v27, %v1175_v2  ;;  %vm1196_vm0 = vcmask 916480  }
 0x3a0   :  { %v1428_v63 = vpop.permute.xlu0 %1427 }
 0x3a1   :  { %v1430_v12 = vunpack.i.h.bf16 %v1428_v63  ;;  %v1429_v13 = vunpack.i.l.bf16 %v1428_v63 }
 0x3a2   :  { %v1408_v7 = vpop.permute.xlu1 %1407 }
 0x3a3   :  { %v1410_v9 = vunpack.i.h.bf16 %v1408_v7  ;;  %v1409_v10 = vunpack.i.l.bf16 %v1408_v7 }
 0x3a4   :  { %v1433_v14 = vpop.permute.xlu0 %1432 }
 0x3a5   :  { %v1187_v17 = vsel %vm1186_vm5, %v1185_v59, %v1409_v10  ;;  %v1199_v18 = vsel %vm1186_vm5, %v1198_v11, %v1410_v9  ;;  %v1435_v22 = vunpack.i.h.bf16 %v1433_v14  ;;  %v1434_v21 = vunpack.i.l.bf16 %v1433_v14 }
 0x3a6   :  { %v1189_v19 = vsel %vm1188_vm6, %v1187_v17, %v1429_v13  ;;  %v1200_v20 = vsel %vm1188_vm6, %v1199_v18, %v1430_v12  ;;  %v1179_v23 = vpop.permute.xlu1 %1178 }
 0x3a7   :  { %v1191_v28 = vsel %vm1190_vm7, %v1189_v19, %v1414_v15  ;;  %v1201_v31 = vsel %vm1190_vm7, %v1200_v20, %v1415_v8  ;;  %v1210_v38 = vsel %vm1194_vm9, %v1209_v32, %v1179_v23 }
 0x3a8   :  { %v1193_v34 = vsel %vm1192_vm8, %v1191_v28, %v1434_v21  ;;  %v1202_v26 = vsel %vm1192_vm8, %v1201_v31, %v1435_v22  ;;  %v1438_v35 = vpop.permute.xlu0 %1437 }
 0x3a9   :  { %v1195_v29 = vsel %vm1194_vm9, %v1193_v34, %v1419_v24  ;;  %v1203_v36 = vsel %vm1194_vm9, %v1202_v26, %v1420_v16  ;;  %v1440_v30 = vunpack.i.h.bf16 %v1438_v35  ;;  %v1439_v37 = vunpack.i.l.bf16 %v1438_v35 }
 0x3aa   :  { %v1183_v39 = vpop.permute.xlu1 %1182 }
 0x3ab   :  { %v1197_v40 = vsel %vm1196_vm0, %v1195_v29, %v1439_v37  ;;  %v1204_v33 = vsel %vm1196_vm0, %v1203_v36, %v1440_v30  ;;  %v1211_v41 = vsel %vm1196_vm0, %v1210_v38, %v1183_v39 }
 0x3ac   :  { %v1214_v42 = vpack.c.bf16 %v1211_v41, %v1211_v41  ;;  %v1284_v43 = vpack.c.bf16 %v1204_v33, %v1197_v40 }
 0x3ae   :  { %v1225_v44 = vrot.slane %v1284_v43, %v1806_v45  ;;  %v1232_v46 = vrot.slane %v1214_v42, %v1806_v45 }
 0x3b0   :  { %v1233_v48 = vcombine.low %v1225_v44, %v1232_v46 }
 0x3b2   :  { %1235 = vst [vmem:[%s1876_s4] sm:$0x3f] %v1233_v48 }

</bundles_post_ra>
